<compile_context>
chip_gen: v5e
topology: v5e:2x2
jax: 0.10.0
libtpu: 0.0.40
codegen_flags: <defaults>
</compile_context>

<pallas_src>
import math
import functools

import jax
import jax.numpy as jnp
from jax.experimental import pallas as pl
from jax.experimental.pallas import tpu as pltpu


# ----------------------------------------------------------------------------
# In-kernel helpers
# ----------------------------------------------------------------------------

def _layernorm(x, alpha, bias, eps):
    """torch-style LayerNormalization: unbiased std, (x - mean) / (std + eps)."""
    d = x.shape[-1]
    mean = jnp.mean(x, axis=-1, keepdims=True)
    xc = x - mean
    var = jnp.sum(xc * xc, axis=-1, keepdims=True) * (1.0 / (d - 1))
    return alpha * (xc / (jnp.sqrt(var) + eps)) + bias


# ----------------------------------------------------------------------------
# Kernels
# ----------------------------------------------------------------------------

def _attn_block_kernel(x_ref, bias_ref, wqkv_ref, wo_ref, bo_ref,
                       ln_a_ref, ln_b_ref, o_ref, qkv_scr, ctx_scr,
                       *, h, d_k, eps, compute_dtype):
    """x + W_o(MHA(LN(x))) for one batch element, fully fused in VMEM."""
    x = x_ref[0]                                   # (S, D) f32
    mbias = bias_ref[0, 0]                         # (S, S) f32 additive bias
    d_model = h * d_k

    # --- LayerNorm (pre-norm residual connection) --------------------------
    xn = _layernorm(x, ln_a_ref[...], ln_b_ref[...], eps)

    # --- fused Q/K/V projection: one lane-dense MXU matmul -----------------
    # (1/sqrt(d_k) already folded into the Q columns of wqkv on the host;
    #  one wide cast to compute dtype, staged in VMEM scratch.)
    qkv_scr[...] = jnp.dot(
        xn.astype(compute_dtype), wqkv_ref[...],
        preferred_element_type=jnp.float32).astype(compute_dtype)

    # --- per-head attention; scratch-slab slices, no lane concatenation ----
    for hh in range(h):
        lo = hh * d_k
        q_h = qkv_scr[:, lo:lo + d_k]                                  # (S, d_k)
        k_h = qkv_scr[:, d_model + lo:d_model + lo + d_k]              # (S, d_k)
        v_h = qkv_scr[:, 2 * d_model + lo:2 * d_model + lo + d_k]      # (S, d_k)

        # scores = q @ k^T via dot_general (no in-kernel transpose of k)
        s = jax.lax.dot_general(
            q_h, k_h, dimension_numbers=(((1,), (1,)), ((), ())),
            preferred_element_type=jnp.float32)                        # (S, S)
        s = s + mbias                                                  # mask as additive bias

        # numerically-stable softmax in f32; reciprocal on the EUP slot
        s = s - jnp.max(s, axis=-1, keepdims=True)
        p = jnp.exp(s)
        p = p * pl.reciprocal(jnp.sum(p, axis=-1, keepdims=True), approx=True)

        ctx_scr[:, lo:lo + d_k] = jnp.dot(
            p.astype(compute_dtype), v_h,
            preferred_element_type=jnp.float32)                        # (S, d_k)

    # --- output projection + bias + residual (fused epilogue) --------------
    out = jnp.dot(ctx_scr[...].astype(compute_dtype), wo_ref[...],
                  preferred_element_type=jnp.float32) + bo_ref[...]
    o_ref[0] = (x + out).astype(o_ref.dtype)


def _ffn_block_kernel(y_ref, w1_ref, b1_ref, w2_ref, b2_ref,
                      ln_a_ref, ln_b_ref, o_ref, *, eps, compute_dtype):
    """y + Linear2(ReLU(Linear1(LN(y)))) for one row tile."""
    y = y_ref[...]                                  # (TM, D) f32
    yn = _layernorm(y, ln_a_ref[...], ln_b_ref[...], eps)
    h1 = jnp.dot(yn.astype(compute_dtype), w1_ref[...],
                 preferred_element_type=jnp.float32) + b1_ref[...]
    h1 = jnp.maximum(h1, 0.0)                       # ReLU; dropout = identity (eval)
    out = jnp.dot(h1.astype(compute_dtype), w2_ref[...],
                  preferred_element_type=jnp.float32) + b2_ref[...]
    o_ref[...] = (y + out).astype(o_ref.dtype)


# ----------------------------------------------------------------------------
# Wrapper helpers
# ----------------------------------------------------------------------------

def _vmem_budget_bytes():
    """Per-generation scoped-VMEM budget (85% of physical, 64 MiB fallback)."""
    try:
        cap = int(pltpu.get_tpu_info().vmem_capacity_bytes)
        if cap < (16 << 20):
            cap = 64 << 20
    except Exception:
        cap = 64 << 20   # most restrictive generation (v7x per-core VMEM)
    return int(cap * 0.85)


def _resident_spec(block_shape, index_map):
    """BlockSpec for a grid-constant operand: single-buffered when supported."""
    try:
        return pl.BlockSpec(block_shape, index_map,
                            pipeline_mode=pl.Buffered(buffer_count=1))
    except Exception:
        return pl.BlockSpec(block_shape, index_map)


def _ffn_row_tile(n_rows, vmem_budget):
    """Generation-aware row tile; pad count so the grid is exact (no ragged)."""
    max_tile = 256 if vmem_budget <= (64 << 20) else 1024
    if n_rows <= max_tile:
        return n_rows, n_rows                      # single full-extent block
    tm = max_tile
    n_pad = pl.cdiv(n_rows, tm) * tm
    return tm, n_pad


# ----------------------------------------------------------------------------
# Wrapper
# ----------------------------------------------------------------------------

def encoder_block(x, src_mask, params, h, *, eps=1e-6,
                  compute_dtype=jnp.bfloat16):
    """Pallas implementation of EncoderBlock.forward (inference)."""
    B, S, d_model = x.shape
    assert d_model % h == 0
    d_k = d_model // h
    d_ff = params["w1"].shape[0]
    f32 = jnp.float32
    vmem_budget = _vmem_budget_bytes()

    # One-time host-side prep: concat + transpose + cast + scale-folding.
    inv_sqrt_dk = 1.0 / math.sqrt(d_k)
    w_qkv_t = jnp.concatenate(
        [params["w_q"] * inv_sqrt_dk, params["w_k"], params["w_v"]],
        axis=0).T.astype(compute_dtype)
    w_o_t = params["w_o"].T.astype(compute_dtype)
    b_o = params["b_o"].reshape(1, d_model).astype(f32)
    w1_t = params["w1"].T.astype(compute_dtype)
    b1 = params["b1"].reshape(1, d_ff).astype(f32)
    w2_t = params["w2"].T.astype(compute_dtype)
    b2 = params["b2"].reshape(1, d_model).astype(f32)
    ln1_a = params["ln1_alpha"].reshape(1, d_model).astype(f32)
    ln1_b = params["ln1_bias"].reshape(1, d_model).astype(f32)
    ln2_a = params["ln2_alpha"].reshape(1, d_model).astype(f32)
    ln2_b = params["ln2_bias"].reshape(1, d_model).astype(f32)

    # Mask -> additive bias once on the host (matches masked_fill(-1e9) after
    # softmax to float precision).  Batch-invariant masks stay VMEM-resident.
    mask_bias = jnp.where(src_mask == 0, jnp.float32(-1e9), jnp.float32(0.0))
    Bm = mask_bias.shape[0]
    if Bm == 1:
        mask_spec = _resident_spec((1, 1, S, S), lambda b: (0, 0, 0, 0))
    else:
        mask_spec = pl.BlockSpec((1, 1, S, S), lambda b: (b, 0, 0, 0))

    # ---- residual connection 0: fused self-attention block ----------------
    attn_out = pl.pallas_call(
        functools.partial(_attn_block_kernel, h=h, d_k=d_k, eps=eps,
                          compute_dtype=compute_dtype),
        out_shape=jax.ShapeDtypeStruct((B, S, d_model), x.dtype),
        grid=(B,),
        in_specs=[
            pl.BlockSpec((1, S, d_model), lambda b: (b, 0, 0)),
            mask_spec,
            _resident_spec((d_model, 3 * d_model), lambda b: (0, 0)),
            _resident_spec((d_model, d_model), lambda b: (0, 0)),
            _resident_spec((1, d_model), lambda b: (0, 0)),
            _resident_spec((1, d_model), lambda b: (0, 0)),
            _resident_spec((1, d_model), lambda b: (0, 0)),
        ],
        out_specs=pl.BlockSpec((1, S, d_model), lambda b: (b, 0, 0)),
        scratch_shapes=[
            pltpu.VMEM((S, 3 * d_model), compute_dtype),   # staged qkv
            pltpu.VMEM((S, d_model), jnp.float32),         # per-head ctx slab
        ],
        compiler_params=pltpu.CompilerParams(
            dimension_semantics=("parallel",),
            vmem_limit_bytes=vmem_budget),
    )(x, mask_bias, w_qkv_t, w_o_t, b_o, ln1_a, ln1_b)

    # ---- residual connection 1: fused feed-forward block ------------------
    n_rows = B * S
    y = attn_out.reshape(n_rows, d_model)
    tm, n_pad = _ffn_row_tile(n_rows, vmem_budget)
    if n_pad != n_rows:
        y = jnp.pad(y, ((0, n_pad - n_rows), (0, 0)))

    out = pl.pallas_call(
        functools.partial(_ffn_block_kernel, eps=eps, compute_dtype=compute_dtype),
        out_shape=jax.ShapeDtypeStruct((n_pad, d_model), x.dtype),
        grid=(n_pad // tm,),
        in_specs=[
            pl.BlockSpec((tm, d_model), lambda i: (i, 0)),
            _resident_spec((d_model, d_ff), lambda i: (0, 0)),
            _resident_spec((1, d_ff), lambda i: (0, 0)),
            _resident_spec((d_ff, d_model), lambda i: (0, 0)),
            _resident_spec((1, d_model), lambda i: (0, 0)),
            _resident_spec((1, d_model), lambda i: (0, 0)),
            _resident_spec((1, d_model), lambda i: (0, 0)),
        ],
        out_specs=pl.BlockSpec((tm, d_model), lambda i: (i, 0)),
        compiler_params=pltpu.CompilerParams(
            dimension_semantics=("parallel",),
            vmem_limit_bytes=vmem_budget),
    )(y, w1_t, b1, w2_t, b2, ln2_a, ln2_b)

    if n_pad != n_rows:
        out = out[:n_rows]
    return out.reshape(B, S, d_model)


# ----------------------------------------------------------------------------
# Pure-JAX reference (mirrors the PyTorch module exactly, inference mode)
# ----------------------------------------------------------------------------

def _layernorm_ref(x, alpha, bias, eps):
    mean = x.mean(axis=-1, keepdims=True)
    std = jnp.sqrt(((x - mean) ** 2).sum(axis=-1, keepdims=True) / (x.shape[-1] - 1))
    return alpha * (x - mean) / (std + eps) + bias


def reference(x, mask, params, h, eps=1e-6):
    B, S, d_model = x.shape
    d_k = d_model // h
    xn = _layernorm_ref(x, params["ln1_alpha"], params["ln1_bias"], eps)
    q = (xn @ params["w_q"].T).reshape(B, S, h, d_k).transpose(0, 2, 1, 3)
    k = (xn @ params["w_k"].T).reshape(B, S, h, d_k).transpose(0, 2, 1, 3)
    v = (xn @ params["w_v"].T).reshape(B, S, h, d_k).transpose(0, 2, 1, 3)
    s = jnp.einsum("bhqd,bhkd->bhqk", q, k) / math.sqrt(d_k)
    s = jnp.where(mask == 0, -1e9, s)
    p = jax.nn.softmax(s, axis=-1)
    ctx = jnp.einsum("bhqk,bhkd->bhqd", p, v).transpose(0, 2, 1, 3).reshape(B, S, d_model)
    x1 = x + ctx @ params["w_o"].T + params["b_o"]
    yn = _layernorm_ref(x1, params["ln2_alpha"], params["ln2_bias"], eps)
    ff = jnp.maximum(yn @ params["w1"].T + params["b1"], 0.0) @ params["w2"].T + params["b2"]
    return x1 + ff


if __name__ == "__main__":
    B, S, d_model, h, d_ff = 2, 8, 32, 4, 64

    key0 = jax.random.PRNGKey(0)
    ks = jax.random.split(key0, 14)
    sc = 1.0 / math.sqrt(d_model)
    scf = 1.0 / math.sqrt(d_ff)
    params = {
        "w_q": jax.random.uniform(ks[0], (d_model, d_model), jnp.float32, -sc, sc),
        "w_k": jax.random.uniform(ks[1], (d_model, d_model), jnp.float32, -sc, sc),
        "w_v": jax.random.uniform(ks[2], (d_model, d_model), jnp.float32, -sc, sc),
        "w_o": jax.random.uniform(ks[3], (d_model, d_model), jnp.float32, -sc, sc),
        "b_o": jax.random.uniform(ks[4], (d_model,), jnp.float32, -sc, sc),
        "w1": jax.random.uniform(ks[5], (d_ff, d_model), jnp.float32, -sc, sc),
        "b1": jax.random.uniform(ks[6], (d_ff,), jnp.float32, -sc, sc),
        "w2": jax.random.uniform(ks[7], (d_model, d_ff), jnp.float32, -scf, scf),
        "b2": jax.random.uniform(ks[8], (d_model,), jnp.float32, -scf, scf),
        "ln1_alpha": 1.0 + 0.1 * jax.random.normal(ks[9], (d_model,), jnp.float32),
        "ln1_bias": 0.1 * jax.random.normal(ks[10], (d_model,), jnp.float32),
        "ln2_alpha": 1.0 + 0.1 * jax.random.normal(ks[11], (d_model,), jnp.float32),
        "ln2_bias": 0.1 * jax.random.normal(ks[12], (d_model,), jnp.float32),
    }

    x = jax.random.normal(ks[13], (B, S, d_model), jnp.float32)
    # causal src_mask (B, 1, S, S): 1 = keep, 0 = masked
    src_mask = jnp.tril(jnp.ones((S, S), jnp.float32))[None, None].repeat(B, axis=0)

    ref = reference(x, src_mask, params, h)

    # f32-MXU path: tight check (approx EUP reciprocal only source of deviation).
    out_f32 = jax.block_until_ready(
        encoder_block(x, src_mask, params, h, compute_dtype=jnp.float32))
    assert out_f32.shape == (B, S, d_model)
    assert jnp.allclose(out_f32, ref, atol=5e-3, rtol=5e-3), "f32 path mismatch"

    # bf16-MXU path (default fast path on v5e/v6e/v7x): looser check.
    out_bf16 = jax.block_until_ready(encoder_block(x, src_mask, params, h))
    assert out_bf16.shape == (B, S, d_model)
    assert jnp.allclose(out_bf16, ref, atol=5e-2, rtol=5e-2), "bf16 path mismatch"

    print("KERNEL_OK")
</pallas_src>

<mosaic_0001>
module attributes {stable_mosaic.version = 11 : i64} {
  func.func @_attn_block_kernel(%arg0: i32, %arg1: memref<1x8x32xf32, #tpu.memory_space<vmem>>, %arg2: memref<1x1x8x8xf32, #tpu.memory_space<vmem>>, %arg3: memref<32x96xf32, #tpu.memory_space<vmem>>, %arg4: memref<32x32xf32, #tpu.memory_space<vmem>>, %arg5: memref<1x32xf32, #tpu.memory_space<vmem>>, %arg6: memref<1x32xf32, #tpu.memory_space<vmem>>, %arg7: memref<1x32xf32, #tpu.memory_space<vmem>>, %arg8: memref<1x8x32xf32, #tpu.memory_space<vmem>>, %arg9: memref<8x96xf32, #tpu.memory_space<vmem>>, %arg10: memref<8x32xf32, #tpu.memory_space<vmem>>) attributes {dimension_semantics = [#tpu.dimension_semantics<parallel>], iteration_bounds = array<i64: 2>, scalar_prefetch = 0 : i64, scratch_operands = 2 : i64, tpu.core_type = #tpu.core_type<tc>, window_params = [{transform_indices = @transform_0, window_bounds = array<i64: 1, 8, 32>}, {transform_indices = @transform_1, window_bounds = array<i64: 1, 1, 8, 8>}, {pipeline_mode = #tpu.pipeline_mode<synchronous>, transform_indices = @transform_2, window_bounds = array<i64: 32, 96>}, {pipeline_mode = #tpu.pipeline_mode<synchronous>, transform_indices = @transform_3, window_bounds = array<i64: 32, 32>}, {pipeline_mode = #tpu.pipeline_mode<synchronous>, transform_indices = @transform_4, window_bounds = array<i64: 1, 32>}, {pipeline_mode = #tpu.pipeline_mode<synchronous>, transform_indices = @transform_5, window_bounds = array<i64: 1, 32>}, {pipeline_mode = #tpu.pipeline_mode<synchronous>, transform_indices = @transform_6, window_bounds = array<i64: 1, 32>}, {transform_indices = @transform_7, window_bounds = array<i64: 1, 8, 32>}]} {
    %c0 = arith.constant 0 : index
    %c0_0 = arith.constant 0 : index
    %c0_1 = arith.constant 0 : index
    %0 = vector.load %arg1[%c0, %c0_0, %c0_1] : memref<1x8x32xf32, #tpu.memory_space<vmem>>, vector<1x8x32xf32>
    %1 = vector.shape_cast %0 : vector<1x8x32xf32> to vector<8x32xf32>
    %c0_2 = arith.constant 0 : index
    %c0_3 = arith.constant 0 : index
    %c0_4 = arith.constant 0 : index
    %c0_5 = arith.constant 0 : index
    %2 = vector.load %arg2[%c0_2, %c0_3, %c0_4, %c0_5] : memref<1x1x8x8xf32, #tpu.memory_space<vmem>>, vector<1x1x8x8xf32>
    %3 = vector.shape_cast %2 : vector<1x1x8x8xf32> to vector<8x8xf32>
    %c0_6 = arith.constant 0 : index
    %c0_7 = arith.constant 0 : index
    %4 = vector.load %arg6[%c0_6, %c0_7] : memref<1x32xf32, #tpu.memory_space<vmem>>, vector<1x32xf32>
    %c0_8 = arith.constant 0 : index
    %c0_9 = arith.constant 0 : index
    %5 = vector.load %arg7[%c0_8, %c0_9] : memref<1x32xf32, #tpu.memory_space<vmem>>, vector<1x32xf32>
    %cst = arith.constant dense<0.000000e+00> : vector<8xf32>
    %6 = vector.multi_reduction <add>, %1, %cst [1] : vector<8x32xf32> to vector<8xf32>
    %7 = vector.shape_cast %6 : vector<8xf32> to vector<8x1xf32>
    %cst_10 = arith.constant 3.200000e+01 : f32
    %8 = vector.broadcast %cst_10 : f32 to vector<8x1xf32>
    %9 = arith.divf %7, %8 : vector<8x1xf32>
    %10 = vector.broadcast %9 : vector<8x1xf32> to vector<8x32xf32>
    %11 = arith.subf %1, %10 : vector<8x32xf32>
    %12 = arith.mulf %11, %11 : vector<8x32xf32>
    %cst_11 = arith.constant dense<0.000000e+00> : vector<8xf32>
    %13 = vector.multi_reduction <add>, %12, %cst_11 [1] : vector<8x32xf32> to vector<8xf32>
    %14 = vector.shape_cast %13 : vector<8xf32> to vector<8x1xf32>
    %cst_12 = arith.constant 0.0322580636 : f32
    %15 = vector.broadcast %cst_12 : f32 to vector<8x1xf32>
    %16 = arith.mulf %14, %15 : vector<8x1xf32>
    %17 = math.sqrt %16 : vector<8x1xf32>
    %cst_13 = arith.constant 9.99999997E-7 : f32
    %18 = vector.broadcast %cst_13 : f32 to vector<8x1xf32>
    %19 = arith.addf %17, %18 : vector<8x1xf32>
    %20 = vector.broadcast %19 : vector<8x1xf32> to vector<8x32xf32>
    %21 = arith.divf %11, %20 : vector<8x32xf32>
    %22 = vector.broadcast %4 : vector<1x32xf32> to vector<8x32xf32>
    %23 = arith.mulf %22, %21 : vector<8x32xf32>
    %24 = vector.broadcast %5 : vector<1x32xf32> to vector<8x32xf32>
    %25 = arith.addf %23, %24 : vector<8x32xf32>
    %c0_14 = arith.constant 0 : index
    %c0_15 = arith.constant 0 : index
    %26 = vector.load %arg3[%c0_14, %c0_15] : memref<32x96xf32, #tpu.memory_space<vmem>>, vector<32x96xf32>
    %cst_16 = arith.constant dense<0.000000e+00> : vector<8x96xf32>
    %27 = tpu.matmul %25, %26, %cst_16 {dimension_numbers = #tpu.dot_dimension_numbers<[1], [0], [0], [1], [0, 0, 1, 1], [], []>} : vector<8x32xf32>, vector<32x96xf32>, vector<8x96xf32> -> vector<8x96xf32>
    %c0_17 = arith.constant 0 : index
    %c0_18 = arith.constant 0 : index
    %28 = vector.load %arg9[%c0_17, %c0_18] : memref<8x96xf32, #tpu.memory_space<vmem>>, vector<8x96xf32>
    tpu.vector_store %arg9[%c0_17, %c0_18], %27 {strides = array<i32>} : memref<8x96xf32, #tpu.memory_space<vmem>>, vector<8x96xf32>,
    %c0_19 = arith.constant 0 : index
    %c0_20 = arith.constant 0 : index
    %29 = vector.load %arg9[%c0_19, %c0_20] : memref<8x96xf32, #tpu.memory_space<vmem>>, vector<8x8xf32>
    %c0_21 = arith.constant 0 : index
    %c32 = arith.constant 32 : index
    %30 = vector.load %arg9[%c0_21, %c32] : memref<8x96xf32, #tpu.memory_space<vmem>>, vector<8x8xf32>
    %c0_22 = arith.constant 0 : index
    %c64 = arith.constant 64 : index
    %31 = vector.load %arg9[%c0_22, %c64] : memref<8x96xf32, #tpu.memory_space<vmem>>, vector<8x8xf32>
    %cst_23 = arith.constant dense<0.000000e+00> : vector<8x8xf32>
    %32 = tpu.matmul %29, %30, %cst_23 {dimension_numbers = #tpu.dot_dimension_numbers<[1], [1], [0], [0], [0, 0, 1, 0], [], []>} : vector<8x8xf32>, vector<8x8xf32>, vector<8x8xf32> -> vector<8x8xf32>
    %33 = arith.addf %32, %3 : vector<8x8xf32>
    %cst_24 = arith.constant dense<0xFF800000> : vector<8xf32>
    %34 = vector.multi_reduction <maximumf>, %33, %cst_24 [1] : vector<8x8xf32> to vector<8xf32>
    %35 = vector.shape_cast %34 : vector<8xf32> to vector<8x1xf32>
    %36 = vector.broadcast %35 : vector<8x1xf32> to vector<8x8xf32>
    %37 = arith.subf %33, %36 : vector<8x8xf32>
    %38 = math.exp %37 : vector<8x8xf32>
    %cst_25 = arith.constant dense<0.000000e+00> : vector<8xf32>
    %39 = vector.multi_reduction <add>, %38, %cst_25 [1] : vector<8x8xf32> to vector<8xf32>
    %40 = vector.shape_cast %39 : vector<8xf32> to vector<8x1xf32>
    %41 = tpu.reciprocal %40 {approx = true} : vector<8x1xf32> -> vector<8x1xf32>
    %42 = vector.broadcast %41 : vector<8x1xf32> to vector<8x8xf32>
    %43 = arith.mulf %38, %42 : vector<8x8xf32>
    %cst_26 = arith.constant dense<0.000000e+00> : vector<8x8xf32>
    %44 = tpu.matmul %43, %31, %cst_26 {dimension_numbers = #tpu.dot_dimension_numbers<[1], [0], [0], [1], [0, 0, 1, 1], [], []>} : vector<8x8xf32>, vector<8x8xf32>, vector<8x8xf32> -> vector<8x8xf32>
    %c0_27 = arith.constant 0 : index
    %c0_28 = arith.constant 0 : index
    %45 = vector.load %arg10[%c0_27, %c0_28] : memref<8x32xf32, #tpu.memory_space<vmem>>, vector<8x8xf32>
    tpu.vector_store %arg10[%c0_27, %c0_28], %44 {strides = array<i32>} : memref<8x32xf32, #tpu.memory_space<vmem>>, vector<8x8xf32>,
    %c0_29 = arith.constant 0 : index
    %c8 = arith.constant 8 : index
    %46 = vector.load %arg9[%c0_29, %c8] : memref<8x96xf32, #tpu.memory_space<vmem>>, vector<8x8xf32>
    %c0_30 = arith.constant 0 : index
    %c40 = arith.constant 40 : index
    %47 = vector.load %arg9[%c0_30, %c40] : memref<8x96xf32, #tpu.memory_space<vmem>>, vector<8x8xf32>
    %c0_31 = arith.constant 0 : index
    %c72 = arith.constant 72 : index
    %48 = vector.load %arg9[%c0_31, %c72] : memref<8x96xf32, #tpu.memory_space<vmem>>, vector<8x8xf32>
    %cst_32 = arith.constant dense<0.000000e+00> : vector<8x8xf32>
    %49 = tpu.matmul %46, %47, %cst_32 {dimension_numbers = #tpu.dot_dimension_numbers<[1], [1], [0], [0], [0, 0, 1, 0], [], []>} : vector<8x8xf32>, vector<8x8xf32>, vector<8x8xf32> -> vector<8x8xf32>
    %50 = arith.addf %49, %3 : vector<8x8xf32>
    %cst_33 = arith.constant dense<0xFF800000> : vector<8xf32>
    %51 = vector.multi_reduction <maximumf>, %50, %cst_33 [1] : vector<8x8xf32> to vector<8xf32>
    %52 = vector.shape_cast %51 : vector<8xf32> to vector<8x1xf32>
    %53 = vector.broadcast %52 : vector<8x1xf32> to vector<8x8xf32>
    %54 = arith.subf %50, %53 : vector<8x8xf32>
    %55 = math.exp %54 : vector<8x8xf32>
    %cst_34 = arith.constant dense<0.000000e+00> : vector<8xf32>
    %56 = vector.multi_reduction <add>, %55, %cst_34 [1] : vector<8x8xf32> to vector<8xf32>
    %57 = vector.shape_cast %56 : vector<8xf32> to vector<8x1xf32>
    %58 = tpu.reciprocal %57 {approx = true} : vector<8x1xf32> -> vector<8x1xf32>
    %59 = vector.broadcast %58 : vector<8x1xf32> to vector<8x8xf32>
    %60 = arith.mulf %55, %59 : vector<8x8xf32>
    %cst_35 = arith.constant dense<0.000000e+00> : vector<8x8xf32>
    %61 = tpu.matmul %60, %48, %cst_35 {dimension_numbers = #tpu.dot_dimension_numbers<[1], [0], [0], [1], [0, 0, 1, 1], [], []>} : vector<8x8xf32>, vector<8x8xf32>, vector<8x8xf32> -> vector<8x8xf32>
    %c0_36 = arith.constant 0 : index
    %c8_37 = arith.constant 8 : index
    %62 = vector.load %arg10[%c0_36, %c8_37] : memref<8x32xf32, #tpu.memory_space<vmem>>, vector<8x8xf32>
    tpu.vector_store %arg10[%c0_36, %c8_37], %61 {strides = array<i32>} : memref<8x32xf32, #tpu.memory_space<vmem>>, vector<8x8xf32>,
    %c0_38 = arith.constant 0 : index
    %c16 = arith.constant 16 : index
    %63 = vector.load %arg9[%c0_38, %c16] : memref<8x96xf32, #tpu.memory_space<vmem>>, vector<8x8xf32>
    %c0_39 = arith.constant 0 : index
    %c48 = arith.constant 48 : index
    %64 = vector.load %arg9[%c0_39, %c48] : memref<8x96xf32, #tpu.memory_space<vmem>>, vector<8x8xf32>
    %c0_40 = arith.constant 0 : index
    %c80 = arith.constant 80 : index
    %65 = vector.load %arg9[%c0_40, %c80] : memref<8x96xf32, #tpu.memory_space<vmem>>, vector<8x8xf32>
    %cst_41 = arith.constant dense<0.000000e+00> : vector<8x8xf32>
    %66 = tpu.matmul %63, %64, %cst_41 {dimension_numbers = #tpu.dot_dimension_numbers<[1], [1], [0], [0], [0, 0, 1, 0], [], []>} : vector<8x8xf32>, vector<8x8xf32>, vector<8x8xf32> -> vector<8x8xf32>
    %67 = arith.addf %66, %3 : vector<8x8xf32>
    %cst_42 = arith.constant dense<0xFF800000> : vector<8xf32>
    %68 = vector.multi_reduction <maximumf>, %67, %cst_42 [1] : vector<8x8xf32> to vector<8xf32>
    %69 = vector.shape_cast %68 : vector<8xf32> to vector<8x1xf32>
    %70 = vector.broadcast %69 : vector<8x1xf32> to vector<8x8xf32>
    %71 = arith.subf %67, %70 : vector<8x8xf32>
    %72 = math.exp %71 : vector<8x8xf32>
    %cst_43 = arith.constant dense<0.000000e+00> : vector<8xf32>
    %73 = vector.multi_reduction <add>, %72, %cst_43 [1] : vector<8x8xf32> to vector<8xf32>
    %74 = vector.shape_cast %73 : vector<8xf32> to vector<8x1xf32>
    %75 = tpu.reciprocal %74 {approx = true} : vector<8x1xf32> -> vector<8x1xf32>
    %76 = vector.broadcast %75 : vector<8x1xf32> to vector<8x8xf32>
    %77 = arith.mulf %72, %76 : vector<8x8xf32>
    %cst_44 = arith.constant dense<0.000000e+00> : vector<8x8xf32>
    %78 = tpu.matmul %77, %65, %cst_44 {dimension_numbers = #tpu.dot_dimension_numbers<[1], [0], [0], [1], [0, 0, 1, 1], [], []>} : vector<8x8xf32>, vector<8x8xf32>, vector<8x8xf32> -> vector<8x8xf32>
    %c0_45 = arith.constant 0 : index
    %c16_46 = arith.constant 16 : index
    %79 = vector.load %arg10[%c0_45, %c16_46] : memref<8x32xf32, #tpu.memory_space<vmem>>, vector<8x8xf32>
    tpu.vector_store %arg10[%c0_45, %c16_46], %78 {strides = array<i32>} : memref<8x32xf32, #tpu.memory_space<vmem>>, vector<8x8xf32>,
    %c0_47 = arith.constant 0 : index
    %c24 = arith.constant 24 : index
    %80 = vector.load %arg9[%c0_47, %c24] : memref<8x96xf32, #tpu.memory_space<vmem>>, vector<8x8xf32>
    %c0_48 = arith.constant 0 : index
    %c56 = arith.constant 56 : index
    %81 = vector.load %arg9[%c0_48, %c56] : memref<8x96xf32, #tpu.memory_space<vmem>>, vector<8x8xf32>
    %c0_49 = arith.constant 0 : index
    %c88 = arith.constant 88 : index
    %82 = vector.load %arg9[%c0_49, %c88] : memref<8x96xf32, #tpu.memory_space<vmem>>, vector<8x8xf32>
    %cst_50 = arith.constant dense<0.000000e+00> : vector<8x8xf32>
    %83 = tpu.matmul %80, %81, %cst_50 {dimension_numbers = #tpu.dot_dimension_numbers<[1], [1], [0], [0], [0, 0, 1, 0], [], []>} : vector<8x8xf32>, vector<8x8xf32>, vector<8x8xf32> -> vector<8x8xf32>
    %84 = arith.addf %83, %3 : vector<8x8xf32>
    %cst_51 = arith.constant dense<0xFF800000> : vector<8xf32>
    %85 = vector.multi_reduction <maximumf>, %84, %cst_51 [1] : vector<8x8xf32> to vector<8xf32>
    %86 = vector.shape_cast %85 : vector<8xf32> to vector<8x1xf32>
    %87 = vector.broadcast %86 : vector<8x1xf32> to vector<8x8xf32>
    %88 = arith.subf %84, %87 : vector<8x8xf32>
    %89 = math.exp %88 : vector<8x8xf32>
    %cst_52 = arith.constant dense<0.000000e+00> : vector<8xf32>
    %90 = vector.multi_reduction <add>, %89, %cst_52 [1] : vector<8x8xf32> to vector<8xf32>
    %91 = vector.shape_cast %90 : vector<8xf32> to vector<8x1xf32>
    %92 = tpu.reciprocal %91 {approx = true} : vector<8x1xf32> -> vector<8x1xf32>
    %93 = vector.broadcast %92 : vector<8x1xf32> to vector<8x8xf32>
    %94 = arith.mulf %89, %93 : vector<8x8xf32>
    %cst_53 = arith.constant dense<0.000000e+00> : vector<8x8xf32>
    %95 = tpu.matmul %94, %82, %cst_53 {dimension_numbers = #tpu.dot_dimension_numbers<[1], [0], [0], [1], [0, 0, 1, 1], [], []>} : vector<8x8xf32>, vector<8x8xf32>, vector<8x8xf32> -> vector<8x8xf32>
    %c0_54 = arith.constant 0 : index
    %c24_55 = arith.constant 24 : index
    %96 = vector.load %arg10[%c0_54, %c24_55] : memref<8x32xf32, #tpu.memory_space<vmem>>, vector<8x8xf32>
    tpu.vector_store %arg10[%c0_54, %c24_55], %95 {strides = array<i32>} : memref<8x32xf32, #tpu.memory_space<vmem>>, vector<8x8xf32>,
    %c0_56 = arith.constant 0 : index
    %c0_57 = arith.constant 0 : index
    %97 = vector.load %arg10[%c0_56, %c0_57] : memref<8x32xf32, #tpu.memory_space<vmem>>, vector<8x32xf32>
    %c0_58 = arith.constant 0 : index
    %c0_59 = arith.constant 0 : index
    %98 = vector.load %arg4[%c0_58, %c0_59] : memref<32x32xf32, #tpu.memory_space<vmem>>, vector<32x32xf32>
    %cst_60 = arith.constant dense<0.000000e+00> : vector<8x32xf32>
    %99 = tpu.matmul %97, %98, %cst_60 {dimension_numbers = #tpu.dot_dimension_numbers<[1], [0], [0], [1], [0, 0, 1, 1], [], []>} : vector<8x32xf32>, vector<32x32xf32>, vector<8x32xf32> -> vector<8x32xf32>
    %c0_61 = arith.constant 0 : index
    %c0_62 = arith.constant 0 : index
    %100 = vector.load %arg5[%c0_61, %c0_62] : memref<1x32xf32, #tpu.memory_space<vmem>>, vector<1x32xf32>
    %101 = vector.broadcast %100 : vector<1x32xf32> to vector<8x32xf32>
    %102 = arith.addf %99, %101 : vector<8x32xf32>
    %103 = arith.addf %1, %102 : vector<8x32xf32>
    %c0_63 = arith.constant 0 : index
    %c0_64 = arith.constant 0 : index
    %c0_65 = arith.constant 0 : index
    %104 = vector.load %arg8[%c0_63, %c0_64, %c0_65] : memref<1x8x32xf32, #tpu.memory_space<vmem>>, vector<1x8x32xf32>
    %105 = vector.shape_cast %104 : vector<1x8x32xf32> to vector<8x32xf32>
    %106 = vector.shape_cast %103 : vector<8x32xf32> to vector<1x8x32xf32>
    tpu.vector_store %arg8[%c0_63, %c0_64, %c0_65], %106 {strides = array<i32>} : memref<1x8x32xf32, #tpu.memory_space<vmem>>, vector<1x8x32xf32>,
    return
  }
  func.func @transform_0(%arg0: i32) -> (i32, i32, i32) {
    %c0_i32 = arith.constant 0 : i32
    %c0_i32_0 = arith.constant 0 : i32
    %c0_i32_1 = arith.constant 0 : i32
    return %arg0, %c0_i32, %c0_i32_0 : i32, i32, i32
  }
  func.func @transform_1(%arg0: i32) -> (i32, i32, i32, i32) {
    %c0_i32 = arith.constant 0 : i32
    %c0_i32_0 = arith.constant 0 : i32
    %c0_i32_1 = arith.constant 0 : i32
    %c0_i32_2 = arith.constant 0 : i32
    return %arg0, %c0_i32, %c0_i32_0, %c0_i32_1 : i32, i32, i32, i32
  }
  func.func @transform_2(%arg0: i32) -> (i32, i32) {
    %c0_i32 = arith.constant 0 : i32
    %c0_i32_0 = arith.constant 0 : i32
    %c0_i32_1 = arith.constant 0 : i32
    return %c0_i32, %c0_i32_0 : i32, i32
  }
  func.func @transform_3(%arg0: i32) -> (i32, i32) {
    %c0_i32 = arith.constant 0 : i32
    %c0_i32_0 = arith.constant 0 : i32
    %c0_i32_1 = arith.constant 0 : i32
    return %c0_i32, %c0_i32_0 : i32, i32
  }
  func.func @transform_4(%arg0: i32) -> (i32, i32) {
    %c0_i32 = arith.constant 0 : i32
    %c0_i32_0 = arith.constant 0 : i32
    %c0_i32_1 = arith.constant 0 : i32
    return %c0_i32, %c0_i32_0 : i32, i32
  }
  func.func @transform_5(%arg0: i32) -> (i32, i32) {
    %c0_i32 = arith.constant 0 : i32
    %c0_i32_0 = arith.constant 0 : i32
    %c0_i32_1 = arith.constant 0 : i32
    return %c0_i32, %c0_i32_0 : i32, i32
  }
  func.func @transform_6(%arg0: i32) -> (i32, i32) {
    %c0_i32 = arith.constant 0 : i32
    %c0_i32_0 = arith.constant 0 : i32
    %c0_i32_1 = arith.constant 0 : i32
    return %c0_i32, %c0_i32_0 : i32, i32
  }
  func.func @transform_7(%arg0: i32) -> (i32, i32, i32) {
    %c0_i32 = arith.constant 0 : i32
    %c0_i32_0 = arith.constant 0 : i32
    %c0_i32_1 = arith.constant 0 : i32
    return %arg0, %c0_i32, %c0_i32_0 : i32, i32, i32
  }
}

</mosaic_0001>

<bundles_post_ra>
// kernel: tpu_custom_call.1
= control target key start
LH: loop header
LB: loop body
LE: loop exit
PB: predicated region body
PF: predicated region fallthrough
CT: control target
= control target key end

     0   :  { %s1546_s0 = inlined_call_operand.hbm [shape: f32[2,8,32], index: 0, kind: input, shape index: {}]   ;;  %s1547_s1 = inlined_call_operand.hbm [shape: f32[2,1,8,8], index: 1, kind: input, shape index: {}]   ;;  %s1548_s2 = inlined_call_operand.hbm [shape: f32[32,96], index: 2, kind: input, shape index: {}]   ;;  %s1549_s3 = inlined_call_operand.hbm [shape: f32[32,32], index: 3, kind: input, shape index: {}]   ;;  %s1550_s4 = inlined_call_operand.vmem [shape: f32[1,32], index: 4, kind: input, shape index: {}]   ;;  %s1551_s5 = inlined_call_operand.vmem [shape: f32[1,32], index: 5, kind: input, shape index: {}]   ;;  %s1552_s6 = inlined_call_operand.vmem [shape: f32[1,32], index: 6, kind: input, shape index: {}]   ;;  %s1553_s7 = inlined_call_operand.hbm [shape: f32[2,8,32], index: 7, kind: output, shape index: {}]  }
   0x1   :  { %1558 = sst [smem:[#allocation22_spill]] %s1548_s2 }
   0x2   :  { %1559 = sst [smem:[#allocation23_spill]] %s1549_s3 }
   0x3   :  { %12 = vsyncpa [#allocation5], 0 }
   0x4   :  { %14 = vsyncpa [#allocation5 + $0x1], 0 }
   0x5   :  { %15 = vsyncpa [#allocation8], 0 }
   0x6   :  { %17 = vsyncpa [#allocation8 + $0x1], 0 }
   0x7   :  { %18 = vsyncpa [#allocation11], 0 }
   0x8   :  { %19 = vsyncpa [#allocation6], 0 }
   0x9   :  { %21 = vsyncpa [#allocation6 + $0x1], 0  ;;  %s1309_s24 = smov 0   ;;  %s1311_s25 = smov 0  }
   0xa   :  { %s1313_s26 = smov 0   ;;  %s1315_s27 = smov 0  }
   0xb LB: > { %1560 = sst [smem:[#allocation18_spill]] %s1244_s26  ;;  %s1333_s8 = sadd.s32 4294967295, %s1248_s27   ;;  %s1248_s27 = sphi %s1315_s27, %s1574_s27   ;;  %s1244_s26 = sphi %s1313_s26, %s1576_s26   ;;  %s1240_s25 = sphi %s1311_s25, %s1578_s25   ;;  %s1236_s24 = sphi %s1309_s24, %s1577_s24  }
   0xc   : > { %1561 = sst [smem:[#allocation19_spill]] %s1248_s27  ;;  %p904_p0 = scmp.ge.s32.totalorder %s1248_s27, 1 }
   0xd   : > { %s1562_s2 = sld [smem:[#allocation22_spill]]  ;;  %p48_p1 = scmp.eq.s32.totalorder %s1333_s8, 0 }
   0xe   : > { %p215_p2 = scmp.lt.s32.totalorder %s1248_s27, 3  ;;  %s1250_s10 = smov [#allocation9]  }
   0xf   : > { %s228_s11 = sshll.u32 %s1250_s10, 4  ;;  %s1564_s3 = sld [smem:[#allocation23_spill]]  ;;  %s229_s11 = int_to_ptr.vmem [resolvable:$true] %s228_s11 }
  0x10   : > { %p1338_p3 = pnand %p904_p0, %p215_p2  ;;  %s1251_s15 = smov [#allocation10]  }
  0x11   : > { %s242_s16 = sshll.u32 %s1251_s15, 4  ;;  %s1252_s17 = smov 128   ;;  %s243_s16 = int_to_ptr.vmem [resolvable:$true] %s242_s16 }
  0x12   : > { %p950_p4 = pneg %p1338_p3  ;;  %s1253_s18 = smov 8  }
  0x13   : > { %s226_s30 = sshll.u32 %s1562_s2, 4  ;;  %s903_s19 = sadd.s32 4294967294, %s1248_s27   ;;  %s227_s30 = int_to_ptr.hbm [resolvable:$true] %s226_s30 }
  0x14   : > { %p951_p6 = pnand %p950_p4, %p48_p1  ;;  %s1352_s20 = sadd.s32 1, %s1248_s27  }
  0x15   : > { %s240_s14 = sshll.u32 %s1564_s3, 4  ;;  %1565 = sst [smem:[#allocation20_spill]] %s1352_s20  ;;  %s241_s14 = int_to_ptr.hbm [resolvable:$true] %s240_s14 }
  0x16   : > { %953 = dma.hbm_to_vmem [thread:$0]  (!%p951_p6), %s227_s30, 512, %s229_s11, [#allocation8], %s1252_s17, %s1252_s17, %s1253_s18  }
  0x17   : > { %956 = dma.hbm_to_vmem [thread:$0]  (!%p951_p6), %s241_s14, 512, %s243_s16, [#allocation11], %s1252_s17, %s1252_s17, %s1253_s18  }
  0x18   : > { %s31_s21 = ssub.s32 %s1248_s27, %s1352_s20  ;;  %s34_s22 = sadd.s32 1, %s1244_s26 }
  0x19   : > { %p32_p7 = scmp.eq.s32.totalorder %s31_s21, 0  ;;  %p41_p8 = scmp.ne.s32.totalorder %s1244_s26, %s1240_s25 }
  0x1a   : > { %p42_p9 = scmp.eq.s32.totalorder %s1248_s27, 0  ;;  %p47_p10 = scmp.ne.s32.totalorder %s1240_s25, %s1236_s24 }
  0x1b   : > { %s1363_s23 = scalar_select %p32_p7, %s1244_s26, %s34_s22  }
  0x1c   : > { %p1365_p11 = por %p42_p9, %p41_p8  ;;  %p1371_p12 = por %p48_p1, %p47_p10 }
  0x1d   : > { %1566 = sst [smem:[#allocation21_spill]] %s1363_s23  ;;  %p202_p13 = scmp.eq.s32.totalorder %s1333_s8, 1 }
  0x1e   : > { %p208_p0 = scmp.eq.s32.totalorder %s903_s19, 1  ;;  %p970_p2 = scmp.lt.s32.totalorder %s1248_s27, 2 }
  0x1f   : > { %s265_s30 = sand.u32 1, %s1244_s26   ;;  %p1378_p4 = por %p202_p13, %p41_p8 }
  0x20   : > { %p1382_p6 = por %p208_p0, %p47_p10  ;;  %s1386_s12 = sshll.u32 %s265_s30, 3 }
  0x21   : > { %s909_s13 = sshll.u32 %s1248_s27, 3  ;;  %s269_s17 = scalar_lea.vmem [#allocation4], %s1386_s12 }
  0x22   : > { %s273_s16 = scalar_lea.hbm %s1546_s0, %s909_s13  ;;  %s277_s18 = sshll.u32 %s269_s17, 4  ;;  %s278_s18 = int_to_ptr.vmem [resolvable:$true] %s277_s18 }
  0x23   : > { %s275_s19 = sshll.u32 %s273_s16, 4  ;;  %p1395_p7 = pnand %p970_p2, %p1365_p11  ;;  %s276_s19 = int_to_ptr.hbm [resolvable:$true] %s275_s19 }
  0x24   : > { %s292_s3 = scalar_lea.hbm %s1547_s1, %s909_s13  ;;  %s284_s23 = sand.u32 1, %s1248_s27  }
  0x25   : > { %s266_s26 = scalar_lea.sflag [#allocation5], %s265_s30  ;;  %s1110_s14 = sshra.s32 %s276_s19, 4  ;;  %s1111_s14 = int_to_ptr.hbm [resolvable:$true] %s1110_s14 }
  0x26   : > { %s1112_s15 = scalar_lea.hbm %s1111_s14, 8  ;;  %p1114_p9 = pneg %p1395_p7 }
  0x27   : > { %p1113_p8 = scmp.ne.s32.totalorder %s1111_s14, %s1112_s15  ;;  %s1117_s17 = scalar_lea.hbm %s1546_s0, 16 }
  0x28   : > { %p1118_p13 = scmp.lt.s32.totalorder %s1111_s14, %s1546_s0  ;;  %p1119_p0 = scmp.lt.s32.totalorder %s1117_s17, %s1112_s15 }
  0x29   : > { %p1115_p10 = pnand %p1114_p9, %p1113_p8 }
  0x2a   : > { %p1120_p2 = por %p1119_p0, %p1118_p13 }
  0x2b   : > { %p1116_p11 = pneg %p1115_p10 }
  0x2d   : > { %p1121_p5 = pnand %p1120_p2, %p1116_p11 }
  0x2f   : > { %1124 = shalt.err (!%p1121_p5)
}
  0x30   : > { %960 = dma.hbm_to_vmem [thread:$0]  (!%p1395_p7), %s276_s19, 128, %s278_s18, %s266_s26  }
  0x31   : > { %s294_s30 = sshll.u32 %s292_s3, 4  ;;  %s288_s13 = scalar_lea.vmem [#allocation7], %s1386_s12  ;;  %s295_s30 = int_to_ptr.hbm [resolvable:$true] %s294_s30 }
  0x32   : > { %s296_s20 = sshll.u32 %s288_s13, 4  ;;  %s285_s28 = scalar_lea.sflag [#allocation8], %s284_s23  ;;  %s297_s20 = int_to_ptr.vmem [resolvable:$true] %s296_s20 }
  0x33   : > { %s1140_s16 = sshra.s32 %s295_s30, 4  ;;  %s1147_s17 = scalar_lea.hbm %s1547_s1, 16  ;;  %s1141_s16 = int_to_ptr.hbm [resolvable:$true] %s1140_s16 }
  0x34   : > { %s1142_s27 = scalar_lea.hbm %s1141_s16, 8  ;;  %p1148_p5 = scmp.lt.s32.totalorder %s1141_s16, %s1547_s1 }
  0x35   : > { %p1143_p8 = scmp.ne.s32.totalorder %s1141_s16, %s1142_s27  ;;  %p1149_p13 = scmp.lt.s32.totalorder %s1147_s17, %s1142_s27 }
  0x37   : > { %p1145_p10 = pnand %p1143_p8, %p1114_p9  ;;  %p1150_p0 = por %p1149_p13, %p1148_p5 }
  0x39   : > { %p1146_p11 = pneg %p1145_p10 }
  0x3b   : > { %p1151_p2 = pnand %p1150_p0, %p1146_p11 }
  0x3d   : > { %1154 = shalt.err (!%p1151_p2)
}
  0x3e   : > { %963 = dma.hbm_to_vmem [thread:$0]  (!%p1395_p7), %s295_s30, 128, %s297_s20, %s285_s28  }
  0x3f   : > { %305 = sbr.rel (%p1338_p3) target bundleno = 1420 (0x58c), region = 48  ;;  %s1431_s3 = sand.u32 (!%p1338_p3), 1, %s1240_s25  }
  0x40   : > { %s1434_s23 = sshll.u32 (!%p1338_p3), %s1431_s3, 3  ;;  %s308_s12 = scalar_lea.sflag (!%p1338_p3), [#allocation5], %s1431_s3 }
  0x41   : > { %s311_s27 = scalar_lea.vmem (!%p1338_p3), [#allocation4], %s1434_s23 }
  0x44   : > { %1215 = dma.done.wait (%p1371_p12), %s308_s12, 128  }
  0x45   : > { %1217 = vsyncadd (%p1371_p12), %s308_s12, 4294967168  ;;  %s317_s9 = sand.u32 1, %s1333_s8   ;;  %s321_s18 = scalar_lea.vmem [#allocation7], %s1434_s23 }
  0x46   : > { %s318_s20 = scalar_lea.sflag [#allocation8], %s317_s9 }
  0x47   : > { %1219 = dma.done.wait (%p1371_p12), %s318_s20, 128  }
  0x48   : > { %1221 = vsyncadd (%p1371_p12), %s318_s20, 4294967168 }
  0x49   : > { %1223 = dma.done.wait (%p48_p1), [#allocation8], 512  }
  0x4a   : > { %1225 = vsyncadd (%p48_p1), [#allocation8], 4294966784 }
  0x4b   : > { %1227 = dma.done.wait (%p48_p1), [#allocation11], 512  }
  0x4c   : > { %1229 = vsyncadd (%p48_p1), [#allocation11], 4294966784  ;;  %vm372_vm0 = vcmask 261120   ;;  %v1456_v0 = vld [vmem:[%s311_s27] sm:$0xff]  ;;  %v1254_v2 = vmov 32.0   ;;  %v429_v14 = vld [vmem:[#allocation9 + $0x18] sm:$0xff] }
  0x4d   : > { %v373_v1 = vsel %vm372_vm0, %v1456_v0, 0.0  ;;  %1028 = vrcp.f32 %v1254_v2  ;;  %v428_v15 = vld [vmem:[#allocation9 + $0x10] sm:$0xff]  ;;  %445 = vmatpush.msra.mxu0 %v429_v14  ;;  %v427_v16 = vld [vmem:[#allocation9 + $0x8] sm:$0xff]  ;;  %v426_v17 = vld [vmem:[#allocation9] sm:$0xff]  ;;  %vm453_vm8 = vcmask 785408   ;;  %s1255_s30 = smov 72  }
  0x4e   : > { %374 = vadd.xlane.f32.xlu0 %v373_v1  ;;  %v1025_v40 = vld [vmem:[%s1551_s5] ss:$0 sm:$0xff]  ;;  %s1256_s13 = smov 120   ;;  %s1257_s28 = smov 96   ;;  %vm459_vm9 = vcmask 64512   ;;  %vm593_vm10 = vcmask 130112  }
  0x4f   : > { %446 = vmatpush.msra.mxu0 %v428_v15  ;;  %v1026_v43 = vld [vmem:[%s1552_s6] ss:$0 sm:$0xff]  ;;  %s1258_s16 = smov 80   ;;  %s1259_s14 = smov 88   ;;  %vm666_vm11 = vcmask 195712   ;;  %vm739_vm12 = vcmask 261312  }
  0x50   : > { %s1260_s15 = smov 104   ;;  %s1261_s17 = smov 112   ;;  %v369_v55 = vld [vmem:[%s321_s18] sm:$0xff] }
  0x51   : > { %447 = vmatpush.msra.mxu0 %v427_v16  ;;  %s1262_s2 = smov 64   ;;  %s1263_s26 = smov 40  }
  0x52   : > { %s1264_s12 = smov 56   ;;  %s1265_s27 = smov 48  }
  0x53   : > { %v1029_v3 = vpop.eup %1028  ;;  %448 = vmatpush.msra.mxu0 %v426_v17  ;;  %s1266_s9 = smov 16   ;;  %s1267_s20 = smov 8  }
  0x54   : > { %v377_v4 = vmul.f32 32.0, %v1029_v3  ;;  %vm381_vm1 = vweird.f32 %v1029_v3  ;;  %s1268_s18 = smov 24   ;;  %s933_s29 = sshll.u32 %s1333_s8, 3 }
  0x55   : > { %s776_s8 = scalar_lea.sflag [#allocation6], %s1431_s3 }
  0x56   : > { %v378_v5 = vsub.f32 1.0, %v377_v4 }
  0x58   : > { %v379_v6 = vmul.f32 %v1029_v3, %v378_v5 }
  0x5a   : > { %v380_v7 = vadd.f32 %v1029_v3, %v379_v6 }
  0x5c   : > { %v382_v8 = vsel %vm381_vm1, %v1029_v3, %v380_v7 }
  0xc1   : > { %v375_v9 = vpop.xlane.xlu0 %374 }
  0xc2   : > { %v383_v10 = vmul.f32 %v382_v8, %v375_v9 }
  0xc4   : > { %v384_v11 = vsub.f32 %v1456_v0, %v383_v10 }
  0xc6   : > { %v385_v12 = vmul.f32 %v384_v11, %v384_v11 }
  0xc8   : > { %v386_v13 = vsel %vm372_vm0, %v385_v12, 0.0 }
  0xc9   : > { %387 = vadd.xlane.f32.xlu0 %v386_v13 }
 0x13c   : > { %v388_v18 = vpop.xlane.xlu0 %387 }
 0x13d   : > { %v389_v19 = vmul.f32 0.032258064, %v388_v18 }
 0x13f   : > { %1030 = vrsqrt.f32 %v389_v19  ;;  %vm397_vm2 = vcmp.eq.f32.partialorder %v389_v19, inf  ;;  %v400_v27 = vand.u32 2147483648, %v389_v19  ;;  %vm399_vm3 = vcmp.eq.f32.partialorder %v389_v19, 0.0 }
 0x145   : > { %v1031_v20 = vpop.eup %1030 }
 0x146   : > { %v391_v21 = vmul.f32 %v1031_v20, %v389_v19 }
 0x148   : > { %v392_v22 = vmul.f32 %v1031_v20, %v391_v21 }
 0x14a   : > { %v393_v23 = vmul.f32 0.5, %v392_v22 }
 0x14c   : > { %v394_v24 = vsub.f32 1.5, %v393_v23 }
 0x14e   : > { %v395_v25 = vmul.f32 %v1031_v20, %v394_v24 }
 0x150   : > { %v396_v26 = vmul.f32 %v395_v25, %v389_v19 }
 0x152   : > { %v398_v28 = vsel %vm397_vm2, %v389_v19, %v396_v26 }
 0x153   : > { %v401_v29 = vsel %vm399_vm3, %v400_v27, %v398_v28 }
 0x154   : > { %v402_v30 = vadd.f32 1e-06, %v401_v29 }
 0x156   : > { %1032 = vrcp.f32 %v402_v30  ;;  %v414_v34 = vand.u32 2147483648, %v402_v30  ;;  %v412_v36 = vand.u32 2147483647, %v402_v30  ;;  %vm408_vm5 = vweird.f32 %v402_v30 }
 0x158   : > { %v415_v38 = vor.u32 1.1754944e-38, %v414_v34  ;;  %vm413_vm7 = vcmp.eq.f32.partialorder %v412_v36, 8.507059e+37 }
 0x15c   : > { %v1033_v31 = vpop.eup %1032 }
 0x15d   : > { %v404_v32 = vmul.f32 %v1033_v31, %v402_v30  ;;  %vm409_vm4 = vweird.f32 %v1033_v31 }
 0x15e   : > { %vm410_vm6 = vmor %vm408_vm5, %vm409_vm4 }
 0x15f   : > { %v405_v33 = vsub.f32 1.0, %v404_v32 }
 0x161   : > { %v406_v35 = vmul.f32 %v1033_v31, %v405_v33 }
 0x163   : > { %v407_v37 = vadd.f32 %v1033_v31, %v406_v35 }
 0x165   : > { %v411_v39 = vsel %vm410_vm6, %v1033_v31, %v407_v37 }
 0x166   : > { %v416_v41 = vsel %vm413_vm7, %v415_v38, %v411_v39 }
 0x167   : > { %v417_v42 = vmul.f32 %v416_v41, %v384_v11 }
 0x169   : > { %v421_v44 = vmul.f32 %v1025_v40, %v417_v42 }
 0x16b   : > { %v425_v45 = vadd.f32 %v1026_v43, %v421_v44 }
 0x16d   : > { %918 = vmatmul.msk.f32.vlgmr.msra.gmra.mxu0 %vm372_vm0, %v425_v45  ;;  %v745_v45 = vld [vmem:[#allocation10 + $0x18] sm:$0xff] }
 0x1ea   : > { %v450_v46 = vpop.f32.mrf.mxu0 }
 0x1eb   : > { %454 = vst.msk [vmem:[#allocation2] sm:$0xff] %vm453_vm8, %v450_v46  ;;  %v744_v46 = vld [vmem:[#allocation10 + $0x10] sm:$0xff] }
 0x1f2   : > { %v1469_v47 = vld [vmem:[#allocation2] sm:$0xff] }
 0x1f3   : > { %672 = vrot.lane.b32.xlu0 %v1469_v47, %s1255_s30  ;;  %524 = vrot.lane.b32.xlu2 %v1469_v47, %s1256_s13  ;;  %s786_s13 = scalar_lea.hbm %s1553_s7, %s933_s29 }
 0x1f4   : > { %457 = vrot.lane.b32.xlu1 %v1469_v47, %s1257_s28  ;;  %s367_s28 = scalar_lea.vmem [#allocation12], %s1434_s23  ;;  %s1190_s23 = scalar_lea.hbm %s1553_s7, 16 }
 0x1fb   : > { %599 = vrot.lane.b32.xlu2 %v1469_v47, %s1258_s16  ;;  %s788_s16 = sshll.u32 %s367_s28, 4  ;;  %s789_s16 = int_to_ptr.vmem [resolvable:$true] %s788_s16 }
 0x1fc   : > { %526 = vrot.lane.b32.xlu1 %v1469_v47, %s1259_s14  ;;  %s790_s14 = sshll.u32 %s786_s13, 4  ;;  %s791_s14 = int_to_ptr.hbm [resolvable:$true] %s790_s14 }
 0x203   : > { %670 = vrot.lane.b32.xlu2 %v1469_v47, %s1260_s15  ;;  %s1184_s15 = sshra.s32 %s791_s14, 4  ;;  %s1185_s15 = int_to_ptr.hbm [resolvable:$true] %s1184_s15 }
 0x204   : > { %597 = vrot.lane.b32.xlu1 %v1469_v47, %s1261_s17  ;;  %s1186_s17 = scalar_lea.hbm %s1185_s15, 8  ;;  %p1191_p7 = scmp.lt.s32.totalorder %s1185_s15, %s1553_s7 }
 0x205   : > { %p1187_p1 = scmp.ne.s32.totalorder %s1185_s15, %s1186_s17  ;;  %p1192_p9 = scmp.lt.s32.totalorder %s1190_s23, %s1186_s17 }
 0x207   : > { %p1188_p3 = pnand %p1187_p1, %p1378_p4  ;;  %p1193_p8 = por %p1192_p9, %p1191_p7 }
 0x209   : > { %p1189_p12 = pneg %p1188_p3 }
 0x20b   : > { %p1194_p10 = pnand %p1193_p8, %p1189_p12 }
 0x24d   : > { %v525_v48 = vpop.permute.xlu2 %524 }
 0x255   : > { %v600_v49 = vpop.permute.xlu2 %599 }
 0x25d   : > { %v671_v52 = vpop.permute.xlu2 %670 }
 0x265   : > { %v673_v50 = vpop.permute.xlu0 %672 }
 0x266   : > { %v458_v51 = vpop.permute.xlu1 %457  ;;  %928 = vmatpush.xpose.msk.msrb.mxu0 %vm459_vm9, %v673_v50 }
 0x267   : > { %919 = vmatpush.xpose.msk.msra.mxu1 %vm459_vm9, %v458_v51 }
 0x269   : > { %929 = vmatmul.msk.f32.vlgmr.msrb.gmra.mxu0 %vm459_vm9, %v671_v52 }
 0x26a   : > { %920 = vmatmul.msk.f32.vlgmr.msra.gmra.mxu1 %vm459_vm9, %v1469_v47 }
 0x26b   : > { %925 = vmatpush.xpose.msk.msrb.mxu1 %vm459_vm9, %v600_v49 }
 0x26e   : > { %v527_v53 = vpop.permute.xlu1 %526 }
 0x26f   : > { %922 = vmatpush.xpose.msk.msra.mxu3 %vm459_vm9, %v527_v53  ;;  %765 = vmatpush.msra.mxu1 %v745_v45  ;;  %v1027_v53 = vld [vmem:[%s1550_s4] ss:$0 sm:$0xff] }
 0x271   : > { %766 = vmatpush.msra.mxu1 %v744_v46 }
 0x272   : > { %923 = vmatmul.msk.f32.vlgmr.msra.gmra.mxu3 %vm459_vm9, %v525_v48  ;;  %v742_v48 = vld [vmem:[#allocation10] sm:$0xff] }
 0x276   : > { %v598_v54 = vpop.permute.xlu1 %597 }
 0x277   : > { %926 = vmatmul.msk.f32.vlgmr.msrb.gmra.mxu1 %vm459_vm9, %v598_v54 }
 0x2e6   : > { %v695_v2 = vpop.f32.mrf.mxu0 }
 0x2e7   : > { %v481_v56 = vpop.f32.mrf.mxu1  ;;  %v696_v3 = vadd.f32 %v695_v2, %v369_v55 }
 0x2e8   : > { %v482_v57 = vadd.f32 %v481_v56, %v369_v55 }
 0x2e9   : > { %v698_v4 = vsel %vm459_vm9, %v696_v3, -inf }
 0x2ea   : > { %v484_v58 = vsel %vm459_vm9, %v482_v57, -inf }
 0x2eb   : > { %485 = vmax.xlane.f32.xlu1 %v484_v58 }
 0x2f4   : > { %v622_v59 = vpop.f32.mrf.mxu1 }
 0x2f5   : > { %v623_v60 = vadd.f32 %v622_v59, %v369_v55  ;;  %v549_v61 = vpop.f32.mrf.mxu3 }
 0x2f6   : > { %v550_v62 = vadd.f32 %v549_v61, %v369_v55 }
 0x2f7   : > { %v625_v63 = vsel %vm459_vm9, %v623_v60, -inf }
 0x2f8   : > { %626 = vmax.xlane.f32.xlu0 %v625_v63  ;;  %v552_v1 = vsel %vm459_vm9, %v550_v62, -inf }
 0x2f9   : > { %553 = vmax.xlane.f32.xlu2 %v552_v1 }
 0x301   : > { %699 = vmax.xlane.f32.xlu2 %v698_v4 }
 0x304   : > { %495 = vrot.lane.b32.xlu1 %v1469_v47, %s1262_s2 }
 0x35e   : > { %v486_v5 = vpop.xlane.xlu1 %485 }
 0x35f   : > { %v487_v6 = vsub.f32 %v482_v57, %v486_v5 }
 0x361   : > { %v488_v7 = vmul.f32 1.442695, %v487_v6 }
 0x363   : > { %1034 = vpow2.f32 %v488_v7 }
 0x369   : > { %v1035_v8 = vpop.eup %1034 }
 0x36a   : > { %v490_v9 = vsel %vm459_vm9, %v1035_v8, 0.0 }
 0x36b   : > { %v627_v10 = vpop.xlane.xlu0 %626  ;;  %491 = vadd.xlane.f32.xlu1 %v490_v9 }
 0x36c   : > { %v628_v11 = vsub.f32 %v623_v60, %v627_v10  ;;  %v554_v12 = vpop.xlane.xlu2 %553 }
 0x36d   : > { %v555_v18 = vsub.f32 %v550_v62, %v554_v12 }
 0x36e   : > { %v629_v13 = vmul.f32 1.442695, %v628_v11 }
 0x36f   : > { %v556_v21 = vmul.f32 1.442695, %v555_v18 }
 0x370   : > { %1036 = vpow2.f32 %v629_v13 }
 0x374   : > { %v700_v14 = vpop.xlane.xlu2 %699 }
 0x375   : > { %v701_v15 = vsub.f32 %v696_v3, %v700_v14 }
 0x376   : > { %v1037_v16 = vpop.eup %1036  ;;  %v496_v17 = vpop.permute.xlu1 %495 }
 0x377   : > { %v702_v19 = vmul.f32 1.442695, %v701_v15  ;;  %516 = vmatpush.msra.mxu2 %v496_v17  ;;  %v631_v20 = vsel %vm459_vm9, %v1037_v16, 0.0 }
 0x378   : > { %632 = vadd.xlane.f32.xlu0 %v631_v20 }
 0x379   : > { %1038 = vpow2.f32 %v702_v19 }
 0x37a   : > { %1040 = vpow2.f32 %v556_v21 }
 0x37f   : > { %v1039_v22 = vpop.eup %1038 }
 0x380   : > { %v704_v23 = vsel %vm459_vm9, %v1039_v22, 0.0  ;;  %v1041_v24 = vpop.eup %1040 }
 0x381   : > { %705 = vadd.xlane.f32.xlu2 %v704_v23  ;;  %v558_v25 = vsel %vm459_vm9, %v1041_v24, 0.0 }
 0x384   : > { %709 = vrot.lane.b32.xlu1 %v1469_v47, %s1263_s26 }
 0x389   : > { %559 = vadd.xlane.f32.xlu2 %v558_v25 }
 0x38c   : > { %563 = vrot.lane.b32.xlu0 %v1469_v47, %s1264_s12 }
 0x3a1   : > { %636 = vrot.lane.b32.xlu2 %v1469_v47, %s1265_s27  ;;  %v743_v47 = vld [vmem:[#allocation10 + $0x8] sm:$0xff] }
 0x3a2   : > { %767 = vmatpush.msra.mxu1 %v743_v47 }
 0x3a4   : > { %768 = vmatpush.msra.mxu1 %v742_v48 }
 0x3de   : > { %v492_v26 = vpop.xlane.xlu1 %491 }
 0x3df   : > { %1042 = vrcp.f32 %v492_v26 }
 0x3e5   : > { %v1043_v27 = vpop.eup %1042 }
 0x3e6   : > { %v494_v28 = vmul.f32 %v1043_v27, %v1035_v8 }
 0x3e8   : > { %921 = vmatmul.msk.f32.vlgmr.msra.gmra.mxu2 %vm459_vm9, %v494_v28 }
 0x3eb   : > { %v633_v30 = vpop.xlane.xlu0 %632 }
 0x3ec   : > { %1044 = vrcp.f32 %v633_v30 }
 0x3f2   : > { %v1045_v34 = vpop.eup %1044 }
 0x3f3   : > { %v635_v38 = vmul.f32 %v1045_v34, %v1037_v16 }
 0x3f4   : > { %v706_v29 = vpop.xlane.xlu2 %705 }
 0x3f6   : > { %v710_v33 = vpop.permute.xlu1 %709 }
 0x3fc   : > { %v560_v31 = vpop.xlane.xlu2 %559 }
 0x3fd   : > { %1046 = vrcp.f32 %v560_v31 }
 0x3fe   : > { %v564_v32 = vpop.permute.xlu0 %563  ;;  %1048 = vrcp.f32 %v706_v29 }
 0x3ff   : > { %584 = vmatpush.msrb.mxu2 %v564_v32 }
 0x401   : > { %730 = vmatpush.msra.mxu2 %v710_v33 }
 0x403   : > { %v1047_v35 = vpop.eup %1046 }
 0x404   : > { %v637_v36 = vpop.permute.xlu2 %636  ;;  %v562_v37 = vmul.f32 %v1047_v35, %v1041_v24  ;;  %v1049_v39 = vpop.eup %1048 }
 0x405   : > { %657 = vmatpush.msrb.mxu3 %v637_v36  ;;  %v708_v40 = vmul.f32 %v1049_v39, %v1039_v22 }
 0x406   : > { %924 = vmatmul.msk.f32.vlgmr.msrb.gmra.mxu2 %vm459_vm9, %v562_v37  ;;  %927 = vmatmul.msk.f32.vlgmr.msrb.gmra.mxu3 %vm459_vm9, %v635_v38 }
 0x40e   : > { %930 = vmatmul.msk.f32.vlgmr.msra.gmra.mxu2 %vm459_vm9, %v708_v40 }
 0x46b   : > { %v518_v41 = vpop.f32.mrf.mxu2 }
 0x46c   : > { %521 = vst.msk [vmem:[#allocation3] sm:$0xff] %vm459_vm9, %v518_v41 }
 0x489   : > { %v586_v42 = vpop.f32.mrf.mxu2  ;;  %v659_v43 = vpop.f32.mrf.mxu3 }
 0x48a   : > { %663 = vrot.lane.b32.xlu1 %v659_v43, %s1266_s9  ;;  %590 = vrot.lane.b32.xlu0 %v586_v42, %s1267_s20 }
 0x491   : > { %v732_v44 = vpop.f32.mrf.mxu2 }
 0x492   : > { %736 = vrot.lane.b32.xlu2 %v732_v44, %s1268_s18 }
 0x4ec   : > { %v737_v51 = vpop.permute.xlu2 %736 }
 0x4fc   : > { %v591_v49 = vpop.permute.xlu0 %590  ;;  %v664_v50 = vpop.permute.xlu1 %663 }
 0x4fd   : > { %594 = vst.msk [vmem:[#allocation3] sm:$0xff] %vm593_vm10, %v591_v49 }
 0x4fe   : > { %667 = vst.msk [vmem:[#allocation3] sm:$0xff] %vm666_vm11, %v664_v50 }
 0x4ff   : > { %740 = vst.msk [vmem:[#allocation3] sm:$0xff] %vm739_vm12, %v737_v51 }
 0x506   : > { %v741_v52 = vld [vmem:[#allocation3] sm:$0xff] }
 0x507   : > { %931 = vmatmul.msk.f32.vlgmr.msra.gmra.mxu1 %vm372_vm0, %v741_v52 }
 0x584   : > { %v770_v54 = vpop.f32.mrf.mxu1 }
 0x585   : > { %v771_v55 = vadd.f32 %v1027_v53, %v770_v54 }
 0x587   : > { %v773_v56 = vadd.f32 %v771_v55, %v1456_v0 }
 0x589   : > { %774 = vst.msk [vmem:[%s367_s28] sm:$0xff] %vm372_vm0, %v773_v56 }
 0x58a   : > { %1197 = shalt.err (!%p1194_p10)
}
 0x58b   : > { %948 = dma.vmem_to_hbm [thread:$0]  (%p1378_p4), %s789_s16, 128, %s791_s14, %s776_s8  }
 0x58c PF: > { %s1572_s3 = sld [smem:[#allocation19_spill]]  ;;  %s802_s9 = sand.u32 1, %s1236_s24  }
 0x58d   : > { %s803_s20 = scalar_lea.sflag [#allocation6], %s802_s9 }
 0x592   : > { %p1573_p11 = scmp.ge.s32.totalorder %s1572_s3, 2 }
 0x594   : > { %p965_p5 = pnand %p1573_p11, %p1382_p6 }
 0x596   : > { %p966_p13 = pneg %p965_p5 }
 0x598   : > { %1231 = dma.done.wait (%p966_p13), %s803_s20, 128  }
 0x599   : > { %1233 = vsyncadd (%p966_p13), %s803_s20, 4294967168  ;;  %s1574_s27 = sld [smem:[#allocation20_spill]]  ;;  %s1577_s24 = smov %s1240_s25 }
 0x59a   : > { %s1575_s18 = sld [smem:[#allocation18_spill]] }
 0x59b   : > { %s1576_s26 = sld [smem:[#allocation21_spill]] }
 0x59f   : > { %p24_p0 = scmp.ge.s32.totalorder %s1574_s27, 4  }
 0x5a0   : > { %s1578_s25 = smov %s1575_s18 }
 0x5a1   :  { %26 = sbr.rel (!%p24_p0) target bundleno = 11 (0xb), region = 114 }
 0x5a6   :  { %809 = vsyncpa [#allocation5], 1 }
 0x5a7   :  { %811 = vsyncpa [#allocation5 + $0x1], 1 }
 0x5a8   :  { %812 = vsyncpa [#allocation8], 1 }
 0x5a9   :  { %814 = vsyncpa [#allocation8 + $0x1], 1 }
 0x5aa   :  { %815 = vsyncpa [#allocation11], 1 }
 0x5ab   :  { %816 = vsyncpa [#allocation6], 1 }
 0x5ac   :  { %818 = vsyncpa [#allocation6 + $0x1], 1 }

</bundles_post_ra>
